<compile_context>
chip_gen: v6e
topology: v6e:2x2x1
jax: 0.10.0
libtpu: 0.0.40
codegen_flags: <defaults>
</compile_context>

<pallas_src>
import jax
import jax.numpy as jnp
from jax.experimental import pallas as pl
from jax.experimental.pallas import tpu as pltpu


def _round_up(n, m):
    return ((n + m - 1) // m) * m


def _mlp_kernel(x_ref, w1_ref, b1_ref, w2_ref, b2_ref, w3_ref, b3_ref,
                w4_ref, b4_ref, o_ref):
    """Fused Linear -> ReLU -> Linear -> ReLU -> Linear -> ReLU -> Linear.

    Weights arrive pre-transposed to (in, out) and cast to bf16; biases are
    (1, out) f32.  Dots run on the MXU in bf16 with f32 accumulation; all
    elementwise work (bias add, ReLU) stays in f32.
    """
    h = x_ref[...].astype(jnp.bfloat16)

    h = jnp.dot(h, w1_ref[...], preferred_element_type=jnp.float32) + b1_ref[...]
    h = jnp.maximum(h, 0.0)

    h = jnp.dot(h.astype(jnp.bfloat16), w2_ref[...],
                preferred_element_type=jnp.float32) + b2_ref[...]
    h = jnp.maximum(h, 0.0)

    h = jnp.dot(h.astype(jnp.bfloat16), w3_ref[...],
                preferred_element_type=jnp.float32) + b3_ref[...]
    h = jnp.maximum(h, 0.0)

    out = jnp.dot(h.astype(jnp.bfloat16), w4_ref[...],
                  preferred_element_type=jnp.float32) + b4_ref[...]
    o_ref[...] = out.astype(o_ref.dtype)


def prepare_mlp_params(params):
    """One-time prep (hoisted out of the hot path):
      - transpose PyTorch (out, in) weights to (in, out)
      - cast weights to bf16 for the MXU
      - reshape biases to (1, out), keep f32
      - zero-pad w1's rows so K of the first matmul is a lane-dense multiple of 128
      - zero-pad the last layer to a lane-dense multiple of 128 columns
    """
    in_dim = int(params["w1"].shape[1])
    out_dim = int(params["w4"].shape[0])
    in_pad = _round_up(max(in_dim, 128), 128)
    out_pad = _round_up(max(out_dim, 128), 128)

    prepped = {"in_dim": in_dim, "in_pad": in_pad,
               "out_dim": out_dim, "out_pad": out_pad}
    for i in (1, 2, 3, 4):
        w = jnp.asarray(params[f"w{i}"], jnp.float32).T          # (in, out)
        b = jnp.asarray(params[f"b{i}"], jnp.float32).reshape(1, -1)
        if i == 1 and in_pad != in_dim:
            w = jnp.pad(w, ((0, in_pad - in_dim), (0, 0)))
        if i == 4 and out_pad != out_dim:
            w = jnp.pad(w, ((0, 0), (0, out_pad - out_dim)))
            b = jnp.pad(b, ((0, 0), (0, out_pad - out_dim)))
        prepped[f"w{i}"] = w.astype(jnp.bfloat16)
        prepped[f"b{i}"] = b
    return prepped


def _choose_tiling(batch):
    """Pick (padded_batch, TB, n_steps).

    * TB is a multiple of 8 sublanes, capped at 1024 rows: amortizes the
      ~0.35 us/step grid overhead ~4x vs TB=256 while keeping the
      double-buffered x/out tiles ~1 MiB.
    * Except for tiny batches, the grid has an even number of >=2 steps so the
      "parallel" batch axis can be split across v7x's two TensorCores.
    """
    tb_max = 1024
    b8 = _round_up(max(batch, 8), 8)
    if b8 <= 16:
        return b8, b8, 1
    steps = max(2, -(-b8 // tb_max))
    if steps % 2:
        steps += 1
    tb = _round_up(-(-b8 // steps), 8)
    return steps * tb, tb, steps


def _resident_spec(shape, single_buffer):
    # Constant index_map -> fetched once, stays VMEM-resident for the whole
    # grid.  Single-buffer it so no dead second copy of the weights sits in
    # VMEM (negligible at hidden=256, decisive if hidden scales up on v7x).
    if single_buffer:
        return pl.BlockSpec(shape, lambda i: (0, 0),
                            pipeline_mode=pl.Buffered(1))
    return pl.BlockSpec(shape, lambda i: (0, 0))


def mlp_network_forward(x, prepped, out_dtype=jnp.float32):
    """Run the fused MLP forward pass.

    x:         (B, input_dim) float32
    prepped:   output of prepare_mlp_params()
    out_dtype: jnp.float32 (default, matches PyTorch) or jnp.bfloat16 to halve
               the output writeback stream (useful on v6e at large batch).
    returns    (B, output_dim) out_dtype
    """
    B, in_dim = x.shape
    assert in_dim == prepped["in_dim"], (in_dim, prepped["in_dim"])
    in_pad = prepped["in_pad"]
    out_pad = prepped["out_pad"]
    out_dim = prepped["out_dim"]
    hidden = prepped["w1"].shape[1]

    b_pad, TB, steps = _choose_tiling(B)

    # Pad the input to (b_pad, in_pad): lane-dense K for the first MXU pass and
    # sublane-aligned M for all four matmuls.  Zero rows/cols contribute zero
    # through the (zero-padded) weights and are sliced off at the end.
    if (b_pad, in_pad) != (B, in_dim):
        x = jnp.pad(x, ((0, b_pad - B), (0, in_pad - in_dim)))

    weight_args = []
    for i in (1, 2, 3, 4):
        weight_args.append(prepped[f"w{i}"])
        weight_args.append(prepped[f"b{i}"])

    out_itemsize = jnp.dtype(out_dtype).itemsize

    # VMEM budget: 2x buffered x/out tiles + resident weights (2x worst case if
    # the single-buffer fallback kicks in) + ~3 live (TB, width) f32
    # intermediates.  Clamp to [32 MiB default scoped limit, 64 MiB v7x
    # physical] so the same tile size is safe across v5e/v6e/v7x.
    width = max(hidden, in_pad, out_pad)
    w_bytes = sum(int(a.size) * a.dtype.itemsize for a in weight_args)
    vmem_needed = (2 * TB * in_pad * 4
                   + 2 * TB * out_pad * out_itemsize
                   + 2 * w_bytes
                   + 3 * TB * width * 4)
    vmem_limit = int(min(max(vmem_needed + (4 << 20), 32 << 20), 64 << 20))

    # Honest scheduling hint: real (unpadded) last-layer width, real itemsizes.
    flops = 2 * b_pad * (in_dim * hidden + 2 * hidden * hidden + hidden * out_dim)
    bytes_accessed = int(b_pad * in_pad * 4
                         + w_bytes
                         + b_pad * out_pad * out_itemsize)

    def run(single_buffer_weights):
        in_specs = [pl.BlockSpec((TB, in_pad), lambda i: (i, 0))]
        for a in weight_args:
            in_specs.append(_resident_spec(a.shape, single_buffer_weights))
        return pl.pallas_call(
            _mlp_kernel,
            out_shape=jax.ShapeDtypeStruct((b_pad, out_pad), out_dtype),
            grid=(steps,),
            in_specs=in_specs,
            out_specs=pl.BlockSpec((TB, out_pad), lambda i: (i, 0)),
            compiler_params=pltpu.CompilerParams(
                dimension_semantics=("parallel",),
                vmem_limit_bytes=vmem_limit),
            cost_estimate=pl.CostEstimate(
                flops=flops, transcendentals=0,
                bytes_accessed=bytes_accessed),
        )(x, *weight_args)

    try:
        out_padded = run(single_buffer_weights=True)
    except Exception:
        # Fallback for JAX versions without pipeline_mode / Buffered(1)
        # support on BlockSpec; identical semantics, weights double-buffered.
        out_padded = run(single_buffer_weights=False)

    if (b_pad, out_pad) != (B, out_dim):
        return out_padded[:B, :out_dim]
    return out_padded


def init_mlp_params(key, input_dim, output_dim, hidden_size=256):
    """Deterministic init mimicking PyTorch nn.Linear defaults:
    U(-1/sqrt(fan_in), 1/sqrt(fan_in)) for both weight and bias."""
    dims = [(input_dim, hidden_size),
            (hidden_size, hidden_size),
            (hidden_size, hidden_size),
            (hidden_size, output_dim)]
    params = {}
    for i, (fan_in, fan_out) in enumerate(dims, start=1):
        key, kw, kb = jax.random.split(key, 3)
        bound = 1.0 / jnp.sqrt(jnp.float32(fan_in))
        # PyTorch layout: weight (out_features, in_features), bias (out_features,)
        params[f"w{i}"] = jax.random.uniform(
            kw, (fan_out, fan_in), jnp.float32, -bound, bound)
        params[f"b{i}"] = jax.random.uniform(
            kb, (fan_out,), jnp.float32, -bound, bound)
    return params


def mlp_reference(x, params):
    """Plain-JAX f32 reference of the PyTorch forward for a sanity check."""
    h = x
    for i in (1, 2, 3):
        h = jnp.maximum(h @ params[f"w{i}"].T + params[f"b{i}"], 0.0)
    return h @ params["w4"].T + params["b4"]


if __name__ == "__main__":
    key = jax.random.PRNGKey(0)
    k_param, k_x = jax.random.split(key)

    batch = 8
    input_dim = 16
    hidden_size = 32
    output_dim = 8

    params = init_mlp_params(k_param, input_dim, output_dim, hidden_size)
    x = jax.random.normal(k_x, (batch, input_dim), jnp.float32)

    prepped = prepare_mlp_params(params)   # one-time weight prep (hoisted)

    # Small-batch path (single grid step).
    out = mlp_network_forward(x, prepped)
    out = jax.block_until_ready(out)
    ref = mlp_reference(x, params)
    assert out.shape == (batch, output_dim), out.shape
    # bf16 matmul inputs with f32 accumulation -> loosened tolerance vs f32 ref.
    assert jnp.allclose(out, ref, atol=5e-2, rtol=5e-2), (
        float(jnp.max(jnp.abs(out - ref))))

    # Medium, ragged batch: exercises the even multi-step grid (v7x megacore
    # path) and the batch/in_dim padding + output slicing.
    x2 = jax.random.normal(jax.random.PRNGKey(1), (100, input_dim), jnp.float32)
    out2 = jax.block_until_ready(mlp_network_forward(x2, prepped))
    ref2 = mlp_reference(x2, params)
    assert out2.shape == (100, output_dim), out2.shape
    assert jnp.allclose(out2, ref2, atol=5e-2, rtol=5e-2), (
        float(jnp.max(jnp.abs(out2 - ref2))))

    print("KERNEL_OK")
</pallas_src>

<mosaic_0001>
module attributes {stable_mosaic.version = 11 : i64} {
  func.func @_mlp_kernel(%arg0: i32, %arg1: memref<8x128xf32, #tpu.memory_space<vmem>>, %arg2: memref<128x32xbf16, #tpu.memory_space<vmem>>, %arg3: memref<1x32xf32, #tpu.memory_space<vmem>>, %arg4: memref<32x32xbf16, #tpu.memory_space<vmem>>, %arg5: memref<1x32xf32, #tpu.memory_space<vmem>>, %arg6: memref<32x32xbf16, #tpu.memory_space<vmem>>, %arg7: memref<1x32xf32, #tpu.memory_space<vmem>>, %arg8: memref<32x128xbf16, #tpu.memory_space<vmem>>, %arg9: memref<1x128xf32, #tpu.memory_space<vmem>>, %arg10: memref<8x128xf32, #tpu.memory_space<vmem>>) attributes {dimension_semantics = [#tpu.dimension_semantics<parallel>], iteration_bounds = array<i64: 1>, scalar_prefetch = 0 : i64, scratch_operands = 0 : i64, tpu.core_type = #tpu.core_type<tc>, window_params = [{transform_indices = @transform_0, window_bounds = array<i64: 8, 128>}, {pipeline_mode = #tpu.pipeline_mode<synchronous>, transform_indices = @transform_1, window_bounds = array<i64: 128, 32>}, {pipeline_mode = #tpu.pipeline_mode<synchronous>, transform_indices = @transform_2, window_bounds = array<i64: 1, 32>}, {pipeline_mode = #tpu.pipeline_mode<synchronous>, transform_indices = @transform_3, window_bounds = array<i64: 32, 32>}, {pipeline_mode = #tpu.pipeline_mode<synchronous>, transform_indices = @transform_4, window_bounds = array<i64: 1, 32>}, {pipeline_mode = #tpu.pipeline_mode<synchronous>, transform_indices = @transform_5, window_bounds = array<i64: 32, 32>}, {pipeline_mode = #tpu.pipeline_mode<synchronous>, transform_indices = @transform_6, window_bounds = array<i64: 1, 32>}, {pipeline_mode = #tpu.pipeline_mode<synchronous>, transform_indices = @transform_7, window_bounds = array<i64: 32, 128>}, {pipeline_mode = #tpu.pipeline_mode<synchronous>, transform_indices = @transform_8, window_bounds = array<i64: 1, 128>}, {transform_indices = @transform_9, window_bounds = array<i64: 8, 128>}]} {
    %c0 = arith.constant 0 : index
    %c0_0 = arith.constant 0 : index
    %0 = vector.load %arg1[%c0, %c0_0] : memref<8x128xf32, #tpu.memory_space<vmem>>, vector<8x128xf32>
    %1 = arith.truncf %0 : vector<8x128xf32> to vector<8x128xbf16>
    %c0_1 = arith.constant 0 : index
    %c0_2 = arith.constant 0 : index
    %2 = vector.load %arg2[%c0_1, %c0_2] : memref<128x32xbf16, #tpu.memory_space<vmem>>, vector<128x32xbf16>
    %cst = arith.constant dense<0.000000e+00> : vector<8x32xf32>
    %3 = tpu.matmul %1, %2, %cst {dimension_numbers = #tpu.dot_dimension_numbers<[1], [0], [0], [1], [0, 0, 1, 1], [], []>} : vector<8x128xbf16>, vector<128x32xbf16>, vector<8x32xf32> -> vector<8x32xf32>
    %c0_3 = arith.constant 0 : index
    %c0_4 = arith.constant 0 : index
    %4 = vector.load %arg3[%c0_3, %c0_4] : memref<1x32xf32, #tpu.memory_space<vmem>>, vector<1x32xf32>
    %5 = vector.broadcast %4 : vector<1x32xf32> to vector<8x32xf32>
    %6 = arith.addf %3, %5 : vector<8x32xf32>
    %cst_5 = arith.constant 0.000000e+00 : f32
    %7 = vector.broadcast %cst_5 : f32 to vector<8x32xf32>
    %8 = arith.maximumf %6, %7 : vector<8x32xf32>
    %9 = arith.truncf %8 : vector<8x32xf32> to vector<8x32xbf16>
    %c0_6 = arith.constant 0 : index
    %c0_7 = arith.constant 0 : index
    %10 = vector.load %arg4[%c0_6, %c0_7] : memref<32x32xbf16, #tpu.memory_space<vmem>>, vector<32x32xbf16>
    %cst_8 = arith.constant dense<0.000000e+00> : vector<8x32xf32>
    %11 = tpu.matmul %9, %10, %cst_8 {dimension_numbers = #tpu.dot_dimension_numbers<[1], [0], [0], [1], [0, 0, 1, 1], [], []>} : vector<8x32xbf16>, vector<32x32xbf16>, vector<8x32xf32> -> vector<8x32xf32>
    %c0_9 = arith.constant 0 : index
    %c0_10 = arith.constant 0 : index
    %12 = vector.load %arg5[%c0_9, %c0_10] : memref<1x32xf32, #tpu.memory_space<vmem>>, vector<1x32xf32>
    %13 = vector.broadcast %12 : vector<1x32xf32> to vector<8x32xf32>
    %14 = arith.addf %11, %13 : vector<8x32xf32>
    %cst_11 = arith.constant 0.000000e+00 : f32
    %15 = vector.broadcast %cst_11 : f32 to vector<8x32xf32>
    %16 = arith.maximumf %14, %15 : vector<8x32xf32>
    %17 = arith.truncf %16 : vector<8x32xf32> to vector<8x32xbf16>
    %c0_12 = arith.constant 0 : index
    %c0_13 = arith.constant 0 : index
    %18 = vector.load %arg6[%c0_12, %c0_13] : memref<32x32xbf16, #tpu.memory_space<vmem>>, vector<32x32xbf16>
    %cst_14 = arith.constant dense<0.000000e+00> : vector<8x32xf32>
    %19 = tpu.matmul %17, %18, %cst_14 {dimension_numbers = #tpu.dot_dimension_numbers<[1], [0], [0], [1], [0, 0, 1, 1], [], []>} : vector<8x32xbf16>, vector<32x32xbf16>, vector<8x32xf32> -> vector<8x32xf32>
    %c0_15 = arith.constant 0 : index
    %c0_16 = arith.constant 0 : index
    %20 = vector.load %arg7[%c0_15, %c0_16] : memref<1x32xf32, #tpu.memory_space<vmem>>, vector<1x32xf32>
    %21 = vector.broadcast %20 : vector<1x32xf32> to vector<8x32xf32>
    %22 = arith.addf %19, %21 : vector<8x32xf32>
    %cst_17 = arith.constant 0.000000e+00 : f32
    %23 = vector.broadcast %cst_17 : f32 to vector<8x32xf32>
    %24 = arith.maximumf %22, %23 : vector<8x32xf32>
    %25 = arith.truncf %24 : vector<8x32xf32> to vector<8x32xbf16>
    %c0_18 = arith.constant 0 : index
    %c0_19 = arith.constant 0 : index
    %26 = vector.load %arg8[%c0_18, %c0_19] : memref<32x128xbf16, #tpu.memory_space<vmem>>, vector<32x128xbf16>
    %cst_20 = arith.constant dense<0.000000e+00> : vector<8x128xf32>
    %27 = tpu.matmul %25, %26, %cst_20 {dimension_numbers = #tpu.dot_dimension_numbers<[1], [0], [0], [1], [0, 0, 1, 1], [], []>} : vector<8x32xbf16>, vector<32x128xbf16>, vector<8x128xf32> -> vector<8x128xf32>
    %c0_21 = arith.constant 0 : index
    %c0_22 = arith.constant 0 : index
    %28 = vector.load %arg9[%c0_21, %c0_22] : memref<1x128xf32, #tpu.memory_space<vmem>>, vector<1x128xf32>
    %29 = vector.broadcast %28 : vector<1x128xf32> to vector<8x128xf32>
    %30 = arith.addf %27, %29 : vector<8x128xf32>
    %c0_23 = arith.constant 0 : index
    %c0_24 = arith.constant 0 : index
    %31 = vector.load %arg10[%c0_23, %c0_24] : memref<8x128xf32, #tpu.memory_space<vmem>>, vector<8x128xf32>
    tpu.vector_store %arg10[%c0_23, %c0_24], %30 {strides = array<i32>} : memref<8x128xf32, #tpu.memory_space<vmem>>, vector<8x128xf32>,
    return
  }
  func.func @transform_0(%arg0: i32) -> (i32, i32) {
    %c0_i32 = arith.constant 0 : i32
    %c0_i32_0 = arith.constant 0 : i32
    return %arg0, %c0_i32 : i32, i32
  }
  func.func @transform_1(%arg0: i32) -> (i32, i32) {
    %c0_i32 = arith.constant 0 : i32
    %c0_i32_0 = arith.constant 0 : i32
    %c0_i32_1 = arith.constant 0 : i32
    return %c0_i32, %c0_i32_0 : i32, i32
  }
  func.func @transform_2(%arg0: i32) -> (i32, i32) {
    %c0_i32 = arith.constant 0 : i32
    %c0_i32_0 = arith.constant 0 : i32
    %c0_i32_1 = arith.constant 0 : i32
    return %c0_i32, %c0_i32_0 : i32, i32
  }
  func.func @transform_3(%arg0: i32) -> (i32, i32) {
    %c0_i32 = arith.constant 0 : i32
    %c0_i32_0 = arith.constant 0 : i32
    %c0_i32_1 = arith.constant 0 : i32
    return %c0_i32, %c0_i32_0 : i32, i32
  }
  func.func @transform_4(%arg0: i32) -> (i32, i32) {
    %c0_i32 = arith.constant 0 : i32
    %c0_i32_0 = arith.constant 0 : i32
    %c0_i32_1 = arith.constant 0 : i32
    return %c0_i32, %c0_i32_0 : i32, i32
  }
  func.func @transform_5(%arg0: i32) -> (i32, i32) {
    %c0_i32 = arith.constant 0 : i32
    %c0_i32_0 = arith.constant 0 : i32
    %c0_i32_1 = arith.constant 0 : i32
    return %c0_i32, %c0_i32_0 : i32, i32
  }
  func.func @transform_6(%arg0: i32) -> (i32, i32) {
    %c0_i32 = arith.constant 0 : i32
    %c0_i32_0 = arith.constant 0 : i32
    %c0_i32_1 = arith.constant 0 : i32
    return %c0_i32, %c0_i32_0 : i32, i32
  }
  func.func @transform_7(%arg0: i32) -> (i32, i32) {
    %c0_i32 = arith.constant 0 : i32
    %c0_i32_0 = arith.constant 0 : i32
    %c0_i32_1 = arith.constant 0 : i32
    return %c0_i32, %c0_i32_0 : i32, i32
  }
  func.func @transform_8(%arg0: i32) -> (i32, i32) {
    %c0_i32 = arith.constant 0 : i32
    %c0_i32_0 = arith.constant 0 : i32
    %c0_i32_1 = arith.constant 0 : i32
    return %c0_i32, %c0_i32_0 : i32, i32
  }
  func.func @transform_9(%arg0: i32) -> (i32, i32) {
    %c0_i32 = arith.constant 0 : i32
    %c0_i32_0 = arith.constant 0 : i32
    return %arg0, %c0_i32 : i32, i32
  }
}

module attributes {stable_mosaic.version = 11 : i64} {
  func.func @_mlp_kernel(%arg0: i32, %arg1: memref<8x128xf32, #tpu.memory_space<vmem>>, %arg2: memref<128x32xbf16, #tpu.memory_space<vmem>>, %arg3: memref<1x32xf32, #tpu.memory_space<vmem>>, %arg4: memref<32x32xbf16, #tpu.memory_space<vmem>>, %arg5: memref<1x32xf32, #tpu.memory_space<vmem>>, %arg6: memref<32x32xbf16, #tpu.memory_space<vmem>>, %arg7: memref<1x32xf32, #tpu.memory_space<vmem>>, %arg8: memref<32x128xbf16, #tpu.memory_space<vmem>>, %arg9: memref<1x128xf32, #tpu.memory_space<vmem>>, %arg10: memref<8x128xf32, #tpu.memory_space<vmem>>) attributes {dimension_semantics = [#tpu.dimension_semantics<parallel>], iteration_bounds = array<i64: 1>, scalar_prefetch = 0 : i64, scratch_operands = 0 : i64, tpu.core_type = #tpu.core_type<tc>, window_params = [{transform_indices = @transform_0, window_bounds = array<i64: 8, 128>}, {pipeline_mode = #tpu.pipeline_mode<synchronous>, transform_indices = @transform_1, window_bounds = array<i64: 128, 32>}, {pipeline_mode = #tpu.pipeline_mode<synchronous>, transform_indices = @transform_2, window_bounds = array<i64: 1, 32>}, {pipeline_mode = #tpu.pipeline_mode<synchronous>, transform_indices = @transform_3, window_bounds = array<i64: 32, 32>}, {pipeline_mode = #tpu.pipeline_mode<synchronous>, transform_indices = @transform_4, window_bounds = array<i64: 1, 32>}, {pipeline_mode = #tpu.pipeline_mode<synchronous>, transform_indices = @transform_5, window_bounds = array<i64: 32, 32>}, {pipeline_mode = #tpu.pipeline_mode<synchronous>, transform_indices = @transform_6, window_bounds = array<i64: 1, 32>}, {pipeline_mode = #tpu.pipeline_mode<synchronous>, transform_indices = @transform_7, window_bounds = array<i64: 32, 128>}, {pipeline_mode = #tpu.pipeline_mode<synchronous>, transform_indices = @transform_8, window_bounds = array<i64: 1, 128>}, {transform_indices = @transform_9, window_bounds = array<i64: 8, 128>}]} {
    %c0 = arith.constant 0 : index
    %c0_0 = arith.constant 0 : index
    %0 = vector.load %arg1[%c0, %c0_0] : memref<8x128xf32, #tpu.memory_space<vmem>>, vector<8x128xf32>
    %1 = arith.truncf %0 : vector<8x128xf32> to vector<8x128xbf16>
    %c0_1 = arith.constant 0 : index
    %c0_2 = arith.constant 0 : index
    %2 = vector.load %arg2[%c0_1, %c0_2] : memref<128x32xbf16, #tpu.memory_space<vmem>>, vector<128x32xbf16>
    %cst = arith.constant dense<0.000000e+00> : vector<8x32xf32>
    %3 = tpu.matmul %1, %2, %cst {dimension_numbers = #tpu.dot_dimension_numbers<[1], [0], [0], [1], [0, 0, 1, 1], [], []>} : vector<8x128xbf16>, vector<128x32xbf16>, vector<8x32xf32> -> vector<8x32xf32>
    %c0_3 = arith.constant 0 : index
    %c0_4 = arith.constant 0 : index
    %4 = vector.load %arg3[%c0_3, %c0_4] : memref<1x32xf32, #tpu.memory_space<vmem>>, vector<1x32xf32>
    %5 = vector.broadcast %4 : vector<1x32xf32> to vector<8x32xf32>
    %6 = arith.addf %3, %5 : vector<8x32xf32>
    %cst_5 = arith.constant 0.000000e+00 : f32
    %7 = vector.broadcast %cst_5 : f32 to vector<8x32xf32>
    %8 = arith.maximumf %6, %7 : vector<8x32xf32>
    %9 = arith.truncf %8 : vector<8x32xf32> to vector<8x32xbf16>
    %c0_6 = arith.constant 0 : index
    %c0_7 = arith.constant 0 : index
    %10 = vector.load %arg4[%c0_6, %c0_7] : memref<32x32xbf16, #tpu.memory_space<vmem>>, vector<32x32xbf16>
    %cst_8 = arith.constant dense<0.000000e+00> : vector<8x32xf32>
    %11 = tpu.matmul %9, %10, %cst_8 {dimension_numbers = #tpu.dot_dimension_numbers<[1], [0], [0], [1], [0, 0, 1, 1], [], []>} : vector<8x32xbf16>, vector<32x32xbf16>, vector<8x32xf32> -> vector<8x32xf32>
    %c0_9 = arith.constant 0 : index
    %c0_10 = arith.constant 0 : index
    %12 = vector.load %arg5[%c0_9, %c0_10] : memref<1x32xf32, #tpu.memory_space<vmem>>, vector<1x32xf32>
    %13 = vector.broadcast %12 : vector<1x32xf32> to vector<8x32xf32>
    %14 = arith.addf %11, %13 : vector<8x32xf32>
    %cst_11 = arith.constant 0.000000e+00 : f32
    %15 = vector.broadcast %cst_11 : f32 to vector<8x32xf32>
    %16 = arith.maximumf %14, %15 : vector<8x32xf32>
    %17 = arith.truncf %16 : vector<8x32xf32> to vector<8x32xbf16>
    %c0_12 = arith.constant 0 : index
    %c0_13 = arith.constant 0 : index
    %18 = vector.load %arg6[%c0_12, %c0_13] : memref<32x32xbf16, #tpu.memory_space<vmem>>, vector<32x32xbf16>
    %cst_14 = arith.constant dense<0.000000e+00> : vector<8x32xf32>
    %19 = tpu.matmul %17, %18, %cst_14 {dimension_numbers = #tpu.dot_dimension_numbers<[1], [0], [0], [1], [0, 0, 1, 1], [], []>} : vector<8x32xbf16>, vector<32x32xbf16>, vector<8x32xf32> -> vector<8x32xf32>
    %c0_15 = arith.constant 0 : index
    %c0_16 = arith.constant 0 : index
    %20 = vector.load %arg7[%c0_15, %c0_16] : memref<1x32xf32, #tpu.memory_space<vmem>>, vector<1x32xf32>
    %21 = vector.broadcast %20 : vector<1x32xf32> to vector<8x32xf32>
    %22 = arith.addf %19, %21 : vector<8x32xf32>
    %cst_17 = arith.constant 0.000000e+00 : f32
    %23 = vector.broadcast %cst_17 : f32 to vector<8x32xf32>
    %24 = arith.maximumf %22, %23 : vector<8x32xf32>
    %25 = arith.truncf %24 : vector<8x32xf32> to vector<8x32xbf16>
    %c0_18 = arith.constant 0 : index
    %c0_19 = arith.constant 0 : index
    %26 = vector.load %arg8[%c0_18, %c0_19] : memref<32x128xbf16, #tpu.memory_space<vmem>>, vector<32x128xbf16>
    %cst_20 = arith.constant dense<0.000000e+00> : vector<8x128xf32>
    %27 = tpu.matmul %25, %26, %cst_20 {dimension_numbers = #tpu.dot_dimension_numbers<[1], [0], [0], [1], [0, 0, 1, 1], [], []>} : vector<8x32xbf16>, vector<32x128xbf16>, vector<8x128xf32> -> vector<8x128xf32>
    %c0_21 = arith.constant 0 : index
    %c0_22 = arith.constant 0 : index
    %28 = vector.load %arg9[%c0_21, %c0_22] : memref<1x128xf32, #tpu.memory_space<vmem>>, vector<1x128xf32>
    %29 = vector.broadcast %28 : vector<1x128xf32> to vector<8x128xf32>
    %30 = arith.addf %27, %29 : vector<8x128xf32>
    %c0_23 = arith.constant 0 : index
    %c0_24 = arith.constant 0 : index
    %31 = vector.load %arg10[%c0_23, %c0_24] : memref<8x128xf32, #tpu.memory_space<vmem>>, vector<8x128xf32>
    tpu.vector_store %arg10[%c0_23, %c0_24], %30 {strides = array<i32>} : memref<8x128xf32, #tpu.memory_space<vmem>>, vector<8x128xf32>,
    return
  }
  func.func @transform_0(%arg0: i32) -> (i32, i32) {
    %c0_i32 = arith.constant 0 : i32
    %c0_i32_0 = arith.constant 0 : i32
    return %arg0, %c0_i32 : i32, i32
  }
  func.func @transform_1(%arg0: i32) -> (i32, i32) {
    %c0_i32 = arith.constant 0 : i32
    %c0_i32_0 = arith.constant 0 : i32
    %c0_i32_1 = arith.constant 0 : i32
    return %c0_i32, %c0_i32_0 : i32, i32
  }
  func.func @transform_2(%arg0: i32) -> (i32, i32) {
    %c0_i32 = arith.constant 0 : i32
    %c0_i32_0 = arith.constant 0 : i32
    %c0_i32_1 = arith.constant 0 : i32
    return %c0_i32, %c0_i32_0 : i32, i32
  }
  func.func @transform_3(%arg0: i32) -> (i32, i32) {
    %c0_i32 = arith.constant 0 : i32
    %c0_i32_0 = arith.constant 0 : i32
    %c0_i32_1 = arith.constant 0 : i32
    return %c0_i32, %c0_i32_0 : i32, i32
  }
  func.func @transform_4(%arg0: i32) -> (i32, i32) {
    %c0_i32 = arith.constant 0 : i32
    %c0_i32_0 = arith.constant 0 : i32
    %c0_i32_1 = arith.constant 0 : i32
    return %c0_i32, %c0_i32_0 : i32, i32
  }
  func.func @transform_5(%arg0: i32) -> (i32, i32) {
    %c0_i32 = arith.constant 0 : i32
    %c0_i32_0 = arith.constant 0 : i32
    %c0_i32_1 = arith.constant 0 : i32
    return %c0_i32, %c0_i32_0 : i32, i32
  }
  func.func @transform_6(%arg0: i32) -> (i32, i32) {
    %c0_i32 = arith.constant 0 : i32
    %c0_i32_0 = arith.constant 0 : i32
    %c0_i32_1 = arith.constant 0 : i32
    return %c0_i32, %c0_i32_0 : i32, i32
  }
  func.func @transform_7(%arg0: i32) -> (i32, i32) {
    %c0_i32 = arith.constant 0 : i32
    %c0_i32_0 = arith.constant 0 : i32
    %c0_i32_1 = arith.constant 0 : i32
    return %c0_i32, %c0_i32_0 : i32, i32
  }
  func.func @transform_8(%arg0: i32) -> (i32, i32) {
    %c0_i32 = arith.constant 0 : i32
    %c0_i32_0 = arith.constant 0 : i32
    %c0_i32_1 = arith.constant 0 : i32
    return %c0_i32, %c0_i32_0 : i32, i32
  }
  func.func @transform_9(%arg0: i32) -> (i32, i32) {
    %c0_i32 = arith.constant 0 : i32
    %c0_i32_0 = arith.constant 0 : i32
    return %arg0, %c0_i32 : i32, i32
  }
}

</mosaic_0001>

<bundles_post_ra>
// kernel: tpu_custom_call.1
= control target key start
LH: loop header
LB: loop body
LE: loop exit
PB: predicated region body
PF: predicated region fallthrough
CT: control target
= control target key end

     0   :  { %v489_v1 = vmov 0.0   ;;  %vm490_vm0 = vmmov 0   ;;  %s627_s0 = inlined_call_operand.vmem [shape: f32[8,128], index: 0, kind: input, shape index: {}]   ;;  %s628_s1 = inlined_call_operand.vmem [shape: bf16[128,32], index: 1, kind: input, shape index: {}]   ;;  %s629_s2 = inlined_call_operand.vmem [shape: f32[1,32], index: 2, kind: input, shape index: {}]   ;;  %s630_s3 = inlined_call_operand.vmem [shape: bf16[32,32], index: 3, kind: input, shape index: {}]   ;;  %s631_s4 = inlined_call_operand.vmem [shape: f32[1,32], index: 4, kind: input, shape index: {}]   ;;  %s632_s5 = inlined_call_operand.vmem [shape: bf16[32,32], index: 5, kind: input, shape index: {}]   ;;  %s633_s6 = inlined_call_operand.vmem [shape: f32[1,32], index: 6, kind: input, shape index: {}]   ;;  %s634_s7 = inlined_call_operand.vmem [shape: bf16[32,128], index: 7, kind: input, shape index: {}]   ;;  %s635_s8 = inlined_call_operand.vmem [shape: f32[1,128], index: 8, kind: input, shape index: {}]   ;;  %s636_s9 = inlined_call_operand.hbm [shape: f32[8,128], index: 9, kind: output, shape index: {}]  }
   0x1   :  { %v453_v0 = vld [vmem:[%s628_s1 + $0x38] sm:$0xff]   ;;  %406 = vmatprep.subr.bf16.mxu0 %v489_v1  ;;  %426 = vmatprep.subr.bf16.mxu1 %v489_v1  ;;  %v454_v2 = vld [vmem:[%s628_s1 + $0x30] sm:$0xff]   ;;  %v455_v3 = vld [vmem:[%s628_s1 + $0x28] sm:$0xff]  }
   0x2   :  { %407 = vmatpush3.bf16.msra.mxu0 %v453_v0  ;;  %422 = vmatprep.mubr.msk.bf16.mxu0 %vm490_vm0, %v489_v1  ;;  %v456_v4 = vld [vmem:[%s628_s1 + $0x20] sm:$0xff]  }
   0x3   :  { %408 = vmatprep.subr.bf16.mxu0 %v489_v1  ;;  %430 = vmatprep.mubr.msk.bf16.mxu1 %vm490_vm0, %v489_v1 }
   0x6   :  { %409 = vmatpush3.bf16.msra.mxu0 %v454_v2 }
   0x7   :  { %410 = vmatprep.subr.bf16.mxu0 %v489_v1 }
   0xa   :  { %411 = vmatpush3.bf16.msra.mxu0 %v455_v3 }
   0xb   :  { %412 = vmatprep.subr.bf16.mxu0 %v489_v1 }
   0xc   :  { %14 = vsyncpa [#allocation3], 0  ;;  %v457_v5 = vld [vmem:[%s628_s1 + $0x18] sm:$0xff]   ;;  %v458_v6 = vld [vmem:[%s628_s1 + $0x10] sm:$0xff]   ;;  %vm172_vm1 = vcmask 261120   ;;  %s491_s20 = smov [#allocation2]  }
   0xd   :  { %v459_v7 = vld [vmem:[%s628_s1 + $0x8] sm:$0xff]   ;;  %v460_v8 = vld [vmem:[%s628_s1] sm:$0xff]  }
   0xe   :  { %413 = vmatpush3.bf16.msra.mxu0 %v456_v4  ;;  %v34_v9 = vld [vmem:[%s627_s0] sm:$0xff]  ;;  %v461_v11 = vld [vmem:[%s630_s3 + $0x8] sm:$0xff]  }
   0xf   :  { %414 = vmatprep.subr.bf16.mxu0 %v489_v1  ;;  %v35_v10 = vpack.c.bf16 %v34_v9, %v34_v9  ;;  %427 = vmatpush3.bf16.msra.mxu1 %v461_v11  ;;  %v462_v12 = vld [vmem:[%s630_s3] sm:$0xff]   ;;  %v463_v19 = vld [vmem:[%s632_s5 + $0x8] sm:$0xff]  }
  0x10   :  { %428 = vmatprep.subr.bf16.mxu1 %v489_v1  ;;  %v367_v13 = vld [vmem:[%s629_s2] ss:$0 sm:$0xff]  ;;  %v465_v29 = vld [vmem:[%s634_s7 + $0x8] sm:$0xff]  }
  0x11   :  { %v464_v22 = vld [vmem:[%s632_s5] sm:$0xff]  }
  0x12   :  { %415 = vmatpush3.bf16.msra.mxu0 %v457_v5  ;;  %v376_v23 = vld [vmem:[%s631_s4] ss:$0 sm:$0xff] }
  0x13   :  { %416 = vmatprep.subr.bf16.mxu0 %v489_v1  ;;  %429 = vmatpush3.bf16.msra.mxu1 %v462_v12  ;;  %v466_v32 = vld [vmem:[%s634_s7] sm:$0xff]   ;;  %s359_s7 = sshll.u32 %s491_s20, 4  ;;  %s360_s7 = int_to_ptr.vmem [resolvable:$true] %s359_s7 }
  0x14   :  { %434 = vmatprep.subr.bf16.mxu1 %v489_v1  ;;  %v380_v33 = vld [vmem:[%s633_s6] ss:$0 sm:$0xff]  ;;  %s467_s6 = scalar_lea.vmem %s360_s7, 128  ;;  %p472_p1 = scmp.lt.s32.totalorder %s360_s7, %s360_s7 }
  0x15   :  { %v384_v41 = vld [vmem:[%s635_s8] ss:$0 sm:$0xff]  ;;  %p468_p0 = scmp.ne.s32.totalorder %s360_s7, %s467_s6  ;;  %p473_p2 = scmp.lt.s32.totalorder %s467_s6, %s467_s6 }
  0x16   :  { %417 = vmatpush3.bf16.msra.mxu0 %v458_v6 }
  0x17   :  { %418 = vmatprep.subr.bf16.mxu0 %v489_v1  ;;  %p474_p3 = por %p473_p2, %p472_p1 }
  0x19   :  { %p475_p4 = pnand %p474_p3, %p468_p0 }
  0x1a   :  { %419 = vmatpush3.bf16.msra.mxu0 %v459_v7 }
  0x1b   :  { %420 = vmatprep.subr.bf16.mxu0 %v489_v1 }
  0x1e   :  { %421 = vmatpush3.bf16.msra.mxu0 %v460_v8 }
  0x21   :  { %423 = vmatmul.mubr.bf16.vlgmr.msra.gmra.mxu0 %v35_v10 }
  0xe1   :  { %v141_v14 = vpop.f32.mrf.mxu0 }
  0xe2   :  { %v142_v15 = vadd.f32 %v367_v13, %v141_v14 }
  0xe3   :  { %v424_v16 = vpop.f32.mrf.mxu0 }
  0xe4   :  { %v147_v17 = vmax.f32 %v142_v15, 0.0 }
  0xe5   :  { %v144_v18 = vpop.f32.mrf.mxu0 }
  0xe6   :  { %v148_v20 = vpack.c.bf16 %v147_v17, %v147_v17 }
  0xe7   :  { %v425_v21 = vpop.f32.mrf.mxu0 }
  0xe8   :  { %431 = vmatmul.mubr.msk.bf16.vlgmr.msra.gmra.mxu1 %vm172_vm1, %v148_v20 }
  0xe9   :  { %435 = vmatpush3.bf16.msra.mxu1 %v463_v19  ;;  %438 = vmatprep.mubr.msk.bf16.mxu1 %vm490_vm0, %v489_v1 }
  0xea   :  { %436 = vmatprep.subr.bf16.mxu1 %v489_v1 }
  0xed   :  { %437 = vmatpush3.bf16.msra.mxu1 %v464_v22 }
  0xee   :  { %442 = vmatprep.subr.bf16.mxu1 %v489_v1 }
 0x1a8   :  { %v210_v24 = vpop.f32.mrf.mxu1 }
 0x1a9   :  { %v211_v25 = vadd.f32 %v376_v23, %v210_v24 }
 0x1aa   :  { %v432_v26 = vpop.f32.mrf.mxu1 }
 0x1ab   :  { %v216_v27 = vmax.f32 %v211_v25, 0.0 }
 0x1ac   :  { %v213_v28 = vpop.f32.mrf.mxu1 }
 0x1ad   :  { %v217_v30 = vpack.c.bf16 %v216_v27, %v216_v27 }
 0x1ae   :  { %v433_v31 = vpop.f32.mrf.mxu1 }
 0x1af   :  { %439 = vmatmul.mubr.msk.bf16.vlgmr.msra.gmra.mxu1 %vm172_vm1, %v217_v30 }
 0x1b0   :  { %443 = vmatpush3.bf16.msra.mxu1 %v465_v29  ;;  %446 = vmatprep.mubr.msk.bf16.mxu1 %vm490_vm0, %v489_v1 }
 0x1b1   :  { %444 = vmatprep.subr.bf16.mxu1 %v489_v1 }
 0x1b4   :  { %445 = vmatpush3.bf16.msra.mxu1 %v466_v32 }
 0x26f   :  { %v278_v34 = vpop.f32.mrf.mxu1 }
 0x270   :  { %v279_v35 = vadd.f32 %v380_v33, %v278_v34 }
 0x271   :  { %v440_v36 = vpop.f32.mrf.mxu1 }
 0x272   :  { %v284_v37 = vmax.f32 %v279_v35, 0.0 }
 0x273   :  { %v281_v38 = vpop.f32.mrf.mxu1 }
 0x274   :  { %v285_v39 = vpack.c.bf16 %v284_v37, %v284_v37 }
 0x275   :  { %v441_v40 = vpop.f32.mrf.mxu1 }
 0x276   :  { %447 = vmatmul.mubr.msk.bf16.vlgmr.msra.gmra.mxu1 %vm172_vm1, %v285_v39 }
 0x336   :  { %v346_v42 = vpop.f32.mrf.mxu1 }
 0x337   :  { %v347_v43 = vadd.f32 %v384_v41, %v346_v42 }
 0x338   :  { %v448_v44 = vpop.f32.mrf.mxu1 }
 0x339   :  { %352 = vst [vmem:[#allocation2] sm:$0xff] %v347_v43 }
 0x33a   :  { %v349_v45 = vpop.f32.mrf.mxu1 }
 0x33b   :  { %478 = shalt.err (!%p475_p4)
}
 0x33c   :  { %362 = dma.vmem_to_hbm [thread:$0]  %s360_s7, 128, %s636_s9, [#allocation3]   ;;  %v449_v46 = vpop.f32.mrf.mxu1 }
 0x33d   :  { %487 = dma.done.wait [#allocation3], 128  }
 0x33e   :  { %488 = vsyncadd [#allocation3], 4294967168 }
 0x33f   :  { %366 = vsyncpa [#allocation3], 1 }

// kernel: tpu_custom_call.1
= control target key start
LH: loop header
LB: loop body
LE: loop exit
PB: predicated region body
PF: predicated region fallthrough
CT: control target
= control target key end

     0   :  { %v489_v1 = vmov 0.0   ;;  %vm490_vm0 = vmmov 0   ;;  %s627_s0 = inlined_call_operand.vmem [shape: f32[8,128], index: 0, kind: input, shape index: {}]   ;;  %s628_s1 = inlined_call_operand.vmem [shape: bf16[128,32], index: 1, kind: input, shape index: {}]   ;;  %s629_s2 = inlined_call_operand.vmem [shape: f32[1,32], index: 2, kind: input, shape index: {}]   ;;  %s630_s3 = inlined_call_operand.vmem [shape: bf16[32,32], index: 3, kind: input, shape index: {}]   ;;  %s631_s4 = inlined_call_operand.vmem [shape: f32[1,32], index: 4, kind: input, shape index: {}]   ;;  %s632_s5 = inlined_call_operand.vmem [shape: bf16[32,32], index: 5, kind: input, shape index: {}]   ;;  %s633_s6 = inlined_call_operand.vmem [shape: f32[1,32], index: 6, kind: input, shape index: {}]   ;;  %s634_s7 = inlined_call_operand.vmem [shape: bf16[32,128], index: 7, kind: input, shape index: {}]   ;;  %s635_s8 = inlined_call_operand.vmem [shape: f32[1,128], index: 8, kind: input, shape index: {}]   ;;  %s636_s9 = inlined_call_operand.hbm [shape: f32[8,128], index: 9, kind: output, shape index: {}]  }
   0x1   :  { %v453_v0 = vld [vmem:[%s628_s1 + $0x38] sm:$0xff]   ;;  %406 = vmatprep.subr.bf16.mxu0 %v489_v1  ;;  %426 = vmatprep.subr.bf16.mxu1 %v489_v1  ;;  %v454_v2 = vld [vmem:[%s628_s1 + $0x30] sm:$0xff]   ;;  %v455_v3 = vld [vmem:[%s628_s1 + $0x28] sm:$0xff]  }
   0x2   :  { %407 = vmatpush3.bf16.msra.mxu0 %v453_v0  ;;  %422 = vmatprep.mubr.msk.bf16.mxu0 %vm490_vm0, %v489_v1  ;;  %v456_v4 = vld [vmem:[%s628_s1 + $0x20] sm:$0xff]  }
   0x3   :  { %408 = vmatprep.subr.bf16.mxu0 %v489_v1  ;;  %430 = vmatprep.mubr.msk.bf16.mxu1 %vm490_vm0, %v489_v1 }
   0x6   :  { %409 = vmatpush3.bf16.msra.mxu0 %v454_v2 }
   0x7   :  { %410 = vmatprep.subr.bf16.mxu0 %v489_v1 }
   0xa   :  { %411 = vmatpush3.bf16.msra.mxu0 %v455_v3 }
   0xb   :  { %412 = vmatprep.subr.bf16.mxu0 %v489_v1 }
   0xc   :  { %14 = vsyncpa [#allocation3], 0  ;;  %v457_v5 = vld [vmem:[%s628_s1 + $0x18] sm:$0xff]   ;;  %v458_v6 = vld [vmem:[%s628_s1 + $0x10] sm:$0xff]   ;;  %vm172_vm1 = vcmask 261120   ;;  %s491_s20 = smov [#allocation2]  }
   0xd   :  { %v459_v7 = vld [vmem:[%s628_s1 + $0x8] sm:$0xff]   ;;  %v460_v8 = vld [vmem:[%s628_s1] sm:$0xff]  }
   0xe   :  { %413 = vmatpush3.bf16.msra.mxu0 %v456_v4  ;;  %v34_v9 = vld [vmem:[%s627_s0] sm:$0xff]  ;;  %v461_v11 = vld [vmem:[%s630_s3 + $0x8] sm:$0xff]  }
   0xf   :  { %414 = vmatprep.subr.bf16.mxu0 %v489_v1  ;;  %v35_v10 = vpack.c.bf16 %v34_v9, %v34_v9  ;;  %427 = vmatpush3.bf16.msra.mxu1 %v461_v11  ;;  %v462_v12 = vld [vmem:[%s630_s3] sm:$0xff]   ;;  %v463_v19 = vld [vmem:[%s632_s5 + $0x8] sm:$0xff]  }
  0x10   :  { %428 = vmatprep.subr.bf16.mxu1 %v489_v1  ;;  %v367_v13 = vld [vmem:[%s629_s2] ss:$0 sm:$0xff]  ;;  %v465_v29 = vld [vmem:[%s634_s7 + $0x8] sm:$0xff]  }
  0x11   :  { %v464_v22 = vld [vmem:[%s632_s5] sm:$0xff]  }
  0x12   :  { %415 = vmatpush3.bf16.msra.mxu0 %v457_v5  ;;  %v376_v23 = vld [vmem:[%s631_s4] ss:$0 sm:$0xff] }
  0x13   :  { %416 = vmatprep.subr.bf16.mxu0 %v489_v1  ;;  %429 = vmatpush3.bf16.msra.mxu1 %v462_v12  ;;  %v466_v32 = vld [vmem:[%s634_s7] sm:$0xff]   ;;  %s359_s7 = sshll.u32 %s491_s20, 4  ;;  %s360_s7 = int_to_ptr.vmem [resolvable:$true] %s359_s7 }
  0x14   :  { %434 = vmatprep.subr.bf16.mxu1 %v489_v1  ;;  %v380_v33 = vld [vmem:[%s633_s6] ss:$0 sm:$0xff]  ;;  %s467_s6 = scalar_lea.vmem %s360_s7, 128  ;;  %p472_p1 = scmp.lt.s32.totalorder %s360_s7, %s360_s7 }
  0x15   :  { %v384_v41 = vld [vmem:[%s635_s8] ss:$0 sm:$0xff]  ;;  %p468_p0 = scmp.ne.s32.totalorder %s360_s7, %s467_s6  ;;  %p473_p2 = scmp.lt.s32.totalorder %s467_s6, %s467_s6 }
  0x16   :  { %417 = vmatpush3.bf16.msra.mxu0 %v458_v6 }
  0x17   :  { %418 = vmatprep.subr.bf16.mxu0 %v489_v1  ;;  %p474_p3 = por %p473_p2, %p472_p1 }
  0x19   :  { %p475_p4 = pnand %p474_p3, %p468_p0 }
  0x1a   :  { %419 = vmatpush3.bf16.msra.mxu0 %v459_v7 }
  0x1b   :  { %420 = vmatprep.subr.bf16.mxu0 %v489_v1 }
  0x1e   :  { %421 = vmatpush3.bf16.msra.mxu0 %v460_v8 }
  0x21   :  { %423 = vmatmul.mubr.bf16.vlgmr.msra.gmra.mxu0 %v35_v10 }
  0xe1   :  { %v141_v14 = vpop.f32.mrf.mxu0 }
  0xe2   :  { %v142_v15 = vadd.f32 %v367_v13, %v141_v14 }
  0xe3   :  { %v424_v16 = vpop.f32.mrf.mxu0 }
  0xe4   :  { %v147_v17 = vmax.f32 %v142_v15, 0.0 }
  0xe5   :  { %v144_v18 = vpop.f32.mrf.mxu0 }
  0xe6   :  { %v148_v20 = vpack.c.bf16 %v147_v17, %v147_v17 }
  0xe7   :  { %v425_v21 = vpop.f32.mrf.mxu0 }
  0xe8   :  { %431 = vmatmul.mubr.msk.bf16.vlgmr.msra.gmra.mxu1 %vm172_vm1, %v148_v20 }
  0xe9   :  { %435 = vmatpush3.bf16.msra.mxu1 %v463_v19  ;;  %438 = vmatprep.mubr.msk.bf16.mxu1 %vm490_vm0, %v489_v1 }
  0xea   :  { %436 = vmatprep.subr.bf16.mxu1 %v489_v1 }
  0xed   :  { %437 = vmatpush3.bf16.msra.mxu1 %v464_v22 }
  0xee   :  { %442 = vmatprep.subr.bf16.mxu1 %v489_v1 }
 0x1a8   :  { %v210_v24 = vpop.f32.mrf.mxu1 }
 0x1a9   :  { %v211_v25 = vadd.f32 %v376_v23, %v210_v24 }
 0x1aa   :  { %v432_v26 = vpop.f32.mrf.mxu1 }
 0x1ab   :  { %v216_v27 = vmax.f32 %v211_v25, 0.0 }
 0x1ac   :  { %v213_v28 = vpop.f32.mrf.mxu1 }
 0x1ad   :  { %v217_v30 = vpack.c.bf16 %v216_v27, %v216_v27 }
 0x1ae   :  { %v433_v31 = vpop.f32.mrf.mxu1 }
 0x1af   :  { %439 = vmatmul.mubr.msk.bf16.vlgmr.msra.gmra.mxu1 %vm172_vm1, %v217_v30 }
 0x1b0   :  { %443 = vmatpush3.bf16.msra.mxu1 %v465_v29  ;;  %446 = vmatprep.mubr.msk.bf16.mxu1 %vm490_vm0, %v489_v1 }
 0x1b1   :  { %444 = vmatprep.subr.bf16.mxu1 %v489_v1 }
 0x1b4   :  { %445 = vmatpush3.bf16.msra.mxu1 %v466_v32 }
 0x26f   :  { %v278_v34 = vpop.f32.mrf.mxu1 }
 0x270   :  { %v279_v35 = vadd.f32 %v380_v33, %v278_v34 }
 0x271   :  { %v440_v36 = vpop.f32.mrf.mxu1 }
 0x272   :  { %v284_v37 = vmax.f32 %v279_v35, 0.0 }
 0x273   :  { %v281_v38 = vpop.f32.mrf.mxu1 }
 0x274   :  { %v285_v39 = vpack.c.bf16 %v284_v37, %v284_v37 }
 0x275   :  { %v441_v40 = vpop.f32.mrf.mxu1 }
 0x276   :  { %447 = vmatmul.mubr.msk.bf16.vlgmr.msra.gmra.mxu1 %vm172_vm1, %v285_v39 }
 0x336   :  { %v346_v42 = vpop.f32.mrf.mxu1 }
 0x337   :  { %v347_v43 = vadd.f32 %v384_v41, %v346_v42 }
 0x338   :  { %v448_v44 = vpop.f32.mrf.mxu1 }
 0x339   :  { %352 = vst [vmem:[#allocation2] sm:$0xff] %v347_v43 }
 0x33a   :  { %v349_v45 = vpop.f32.mrf.mxu1 }
 0x33b   :  { %478 = shalt.err (!%p475_p4)
}
 0x33c   :  { %362 = dma.vmem_to_hbm [thread:$0]  %s360_s7, 128, %s636_s9, [#allocation3]   ;;  %v449_v46 = vpop.f32.mrf.mxu1 }
 0x33d   :  { %487 = dma.done.wait [#allocation3], 128  }
 0x33e   :  { %488 = vsyncadd [#allocation3], 4294967168 }
 0x33f   :  { %366 = vsyncpa [#allocation3], 1 }

</bundles_post_ra>
